<compile_context>
chip_gen: v6e
topology: v6e:2x2x1
jax: 0.10.0
libtpu: 0.0.40
codegen_flags: <defaults>
</compile_context>

<pallas_src>
import jax
import jax.numpy as jnp
from jax.experimental import pallas as pl
from jax.experimental.pallas import tpu as pltpu


def _fused_affine_sigmoid_kernel(x_ref, w_ref, b_ref, o_ref):
    # y = sigmoid(x @ W + b)
    #   x_ref: [bm, D_in] (bf16), w_ref: [D_in, D_out] (bf16),
    #   b_ref: [1, D_out] (f32),  o_ref: [bm, D_out] (f32)
    z = jnp.dot(x_ref[...], w_ref[...], preferred_element_type=jnp.float32)
    z = z + b_ref[...]                                   # f32 bias add (VPU)
    o_ref[...] = jax.nn.sigmoid(z).astype(o_ref.dtype)   # sigmoid on EUP, f32


def fuse_params(w1, b1, w2, b2, *, stream_dtype=jnp.bfloat16):
    """Collapse the two Linear layers once, at param-prep time (NOT per call).

    w1: [D_in, D_mid], b1: [1, D_mid], w2: [D_mid, D_out], b2: [1, D_out]
    Returns (w_fused [D_in, D_out] in stream_dtype, b_fused [1, D_out] f32).
    """
    w1f = w1.astype(jnp.float32)
    w2f = w2.astype(jnp.float32)
    w_fused = (w1f @ w2f).astype(stream_dtype)
    b_fused = (b1.astype(jnp.float32) @ w2f + b2.astype(jnp.float32))
    return w_fused, b_fused.astype(jnp.float32)


def logistic_regression_forward(x, w_fused, b_fused, *, block_b=1024):
    """Fused forward: y = sigmoid(x @ w_fused + b_fused).

    x       : [B, D_in]   (any float dtype; streamed as w_fused.dtype)
    w_fused : [D_in, D_out]
    b_fused : [1, D_out]  (f32)
    returns : [B, D_out]  (f32)
    """
    B, D_in = x.shape
    D_out = w_fused.shape[1]

    # Stream x in the same (bf16) dtype as the fused weights.
    x = x.astype(w_fused.dtype)

    # Batch tile: full extent if it fits in one tile, else block_b rows
    # (block_b is a multiple of 16 -> legal bf16 sublane packing; the last
    # partial tile is handled by Pallas with masked writes).
    bm = B if B <= block_b else block_b
    grid = (pl.cdiv(B, bm),)

    out = pl.pallas_call(
        _fused_affine_sigmoid_kernel,
        out_shape=jax.ShapeDtypeStruct((B, D_out), jnp.float32),
        grid_spec=pltpu.PrefetchScalarGridSpec(
            num_scalar_prefetch=0,
            grid=grid,
            in_specs=[
                pl.BlockSpec((bm, D_in), lambda i: (i, 0)),      # batch tile of x
                pl.BlockSpec((D_in, D_out), lambda i: (0, 0)),   # resident fused W
                pl.BlockSpec((1, D_out), lambda i: (0, 0)),      # resident bias
            ],
            out_specs=pl.BlockSpec((bm, D_out), lambda i: (i, 0)),
        ),
        compiler_params=pltpu.CompilerParams(
            # Batch tiles are independent -> shard across TCs on v7x
            # (no-op on v5e/v6e which have a single TC per chip).
            dimension_semantics=("parallel",),
        ),
    )(x, w_fused, b_fused)

    return out


def init_params(key, input_dim, internal_dim, output_dim, dtype=jnp.float32):
    """Deterministic init mimicking torch.nn.Linear (uniform +/- 1/sqrt(fan_in)).
    Weights returned already transposed to [in, out]."""
    k1, k2, k3, k4 = jax.random.split(key, 4)
    bound1 = 1.0 / (input_dim ** 0.5)
    bound2 = 1.0 / (internal_dim ** 0.5)
    w1 = jax.random.uniform(k1, (input_dim, internal_dim), dtype, -bound1, bound1)
    b1 = jax.random.uniform(k2, (1, internal_dim), dtype, -bound1, bound1)
    w2 = jax.random.uniform(k3, (internal_dim, output_dim), dtype, -bound2, bound2)
    b2 = jax.random.uniform(k4, (1, output_dim), dtype, -bound2, bound2)
    return w1, b1, w2, b2


if __name__ == "__main__":
    batch = 8
    input_dim = 32
    internal_dim = 64
    output_dim = 16

    key = jax.random.PRNGKey(0)
    kx, kp = jax.random.split(key)
    x = jax.random.normal(kx, (batch, input_dim), jnp.float32)
    w1, b1, w2, b2 = init_params(kp, input_dim, internal_dim, output_dim)

    # Param-prep (once, outside the hot path): fuse the two Linears.
    w_fused, b_fused = fuse_params(w1, b1, w2, b2)

    out = logistic_regression_forward(x, w_fused, b_fused)
    out = jax.block_until_ready(out)

    # Reference: plain-JAX f32 two-Linear + sigmoid (same math as the PyTorch
    # module).  Tolerance accounts for streaming x/W in bf16 (f32 accumulate);
    # sigmoid output is in [0, 1] so an absolute tolerance of 1e-2 is tight.
    ref = jax.nn.sigmoid((x @ w1 + b1) @ w2 + b2)
    assert out.shape == (batch, output_dim)
    assert jnp.allclose(out, ref, atol=1e-2, rtol=1e-2), (
        float(jnp.max(jnp.abs(out - ref))))

    print("KERNEL_OK")
</pallas_src>

<mosaic_0001>
module attributes {stable_mosaic.version = 11 : i64} {
  func.func @_fused_affine_sigmoid_kernel(%arg0: i32, %arg1: memref<8x32xbf16, #tpu.memory_space<vmem>>, %arg2: memref<32x16xbf16, #tpu.memory_space<vmem>>, %arg3: memref<1x16xf32, #tpu.memory_space<vmem>>, %arg4: memref<8x16xf32, #tpu.memory_space<vmem>>) attributes {dimension_semantics = [#tpu.dimension_semantics<parallel>], iteration_bounds = array<i64: 1>, scalar_prefetch = 0 : i64, scratch_operands = 0 : i64, tpu.core_type = #tpu.core_type<tc>, window_params = [{transform_indices = @transform_0, window_bounds = array<i64: 8, 32>}, {pipeline_mode = #tpu.pipeline_mode<synchronous>, transform_indices = @transform_1, window_bounds = array<i64: 32, 16>}, {pipeline_mode = #tpu.pipeline_mode<synchronous>, transform_indices = @transform_2, window_bounds = array<i64: 1, 16>}, {transform_indices = @transform_3, window_bounds = array<i64: 8, 16>}]} {
    %c0 = arith.constant 0 : index
    %c0_0 = arith.constant 0 : index
    %0 = vector.load %arg1[%c0, %c0_0] : memref<8x32xbf16, #tpu.memory_space<vmem>>, vector<8x32xbf16>
    %c0_1 = arith.constant 0 : index
    %c0_2 = arith.constant 0 : index
    %1 = vector.load %arg2[%c0_1, %c0_2] : memref<32x16xbf16, #tpu.memory_space<vmem>>, vector<32x16xbf16>
    %cst = arith.constant dense<0.000000e+00> : vector<8x16xf32>
    %2 = tpu.matmul %0, %1, %cst {dimension_numbers = #tpu.dot_dimension_numbers<[1], [0], [0], [1], [0, 0, 1, 1], [], []>} : vector<8x32xbf16>, vector<32x16xbf16>, vector<8x16xf32> -> vector<8x16xf32>
    %c0_3 = arith.constant 0 : index
    %c0_4 = arith.constant 0 : index
    %3 = vector.load %arg3[%c0_3, %c0_4] : memref<1x16xf32, #tpu.memory_space<vmem>>, vector<1x16xf32>
    %4 = vector.broadcast %3 : vector<1x16xf32> to vector<8x16xf32>
    %5 = arith.addf %2, %4 : vector<8x16xf32>
    %6 = arith.negf %5 : vector<8x16xf32>
    %7 = math.exp %6 : vector<8x16xf32>
    %cst_5 = arith.constant 1.000000e+00 : f32
    %8 = vector.broadcast %cst_5 : f32 to vector<8x16xf32>
    %9 = arith.addf %8, %7 : vector<8x16xf32>
    %10 = arith.divf %8, %9 : vector<8x16xf32>
    %c0_6 = arith.constant 0 : index
    %c0_7 = arith.constant 0 : index
    %11 = vector.load %arg4[%c0_6, %c0_7] : memref<8x16xf32, #tpu.memory_space<vmem>>, vector<8x16xf32>
    tpu.vector_store %arg4[%c0_6, %c0_7], %10 {strides = array<i32>} : memref<8x16xf32, #tpu.memory_space<vmem>>, vector<8x16xf32>,
    return
  }
  func.func @transform_0(%arg0: i32) -> (i32, i32) {
    %c0_i32 = arith.constant 0 : i32
    %c0_i32_0 = arith.constant 0 : i32
    return %arg0, %c0_i32 : i32, i32
  }
  func.func @transform_1(%arg0: i32) -> (i32, i32) {
    %c0_i32 = arith.constant 0 : i32
    %c0_i32_0 = arith.constant 0 : i32
    %c0_i32_1 = arith.constant 0 : i32
    return %c0_i32, %c0_i32_0 : i32, i32
  }
  func.func @transform_2(%arg0: i32) -> (i32, i32) {
    %c0_i32 = arith.constant 0 : i32
    %c0_i32_0 = arith.constant 0 : i32
    %c0_i32_1 = arith.constant 0 : i32
    return %c0_i32, %c0_i32_0 : i32, i32
  }
  func.func @transform_3(%arg0: i32) -> (i32, i32) {
    %c0_i32 = arith.constant 0 : i32
    %c0_i32_0 = arith.constant 0 : i32
    return %arg0, %c0_i32 : i32, i32
  }
}

</mosaic_0001>

<bundles_post_ra>
// kernel: tpu_custom_call.1
= control target key start
LH: loop header
LB: loop body
LE: loop exit
PB: predicated region body
PF: predicated region fallthrough
CT: control target
= control target key end

     0   :  { %v153_v1 = vmov 0.0   ;;  %vm154_vm0 = vmmov 0   ;;  %s191_s0 = inlined_call_operand.vmem [shape: bf16[8,32], index: 0, kind: input, shape index: {}]   ;;  %s192_s1 = inlined_call_operand.vmem [shape: bf16[32,16], index: 1, kind: input, shape index: {}]   ;;  %s193_s2 = inlined_call_operand.vmem [shape: f32[1,16], index: 2, kind: input, shape index: {}]   ;;  %s194_s3 = inlined_call_operand.hbm [shape: f32[8,16], index: 3, kind: output, shape index: {}]  }
   0x1   :  { %v125_v0 = vld [vmem:[%s192_s1 + $0x8] sm:$0xff]   ;;  %114 = vmatprep.subr.bf16.mxu0 %v153_v1  ;;  %v126_v2 = vld [vmem:[%s192_s1] sm:$0xff]   ;;  %118 = vmatprep.mubr.msk.bf16.mxu0 %vm154_vm0, %v153_v1 }
   0x2   :  { %115 = vmatpush3.bf16.msra.mxu0 %v125_v0 }
   0x3   :  { %116 = vmatprep.subr.bf16.mxu0 %v153_v1 }
   0x4   :  { %8 = vsyncpa [#allocation3], 0  ;;  %v16_v3 = vld [vmem:[%s191_s0] sm:$0xf]  ;;  %vm40_vm1 = vcmask 261120   ;;  %s155_s1 = smov [#allocation2]  }
   0x5   :  { %v106_v4 = vld [vmem:[%s193_s2] ss:$0 sm:$0xff]  ;;  %s98_s20 = sshll.u32 %s155_s1, 4  ;;  %vm90_vm2 = vcmask 130048   ;;  %s99_s20 = int_to_ptr.vmem [resolvable:$true] %s98_s20 }
   0x6   :  { %117 = vmatpush3.bf16.msra.mxu0 %v126_v2  ;;  %s131_s0 = scalar_lea.vmem %s99_s20, 128  ;;  %p136_p1 = scmp.lt.s32.totalorder %s99_s20, %s99_s20 }
   0x7   :  { %p132_p0 = scmp.ne.s32.totalorder %s99_s20, %s131_s0  ;;  %p137_p2 = scmp.lt.s32.totalorder %s131_s0, %s131_s0 }
   0x9   :  { %119 = vmatmul.mubr.msk.bf16.vlgmr.msra.gmra.mxu0 %vm40_vm1, %v16_v3  ;;  %p138_p3 = por %p137_p2, %p136_p1 }
   0xb   :  { %p139_p4 = pnand %p138_p3, %p132_p0 }
  0xc9   :  { %v78_v5 = vpop.f32.mrf.mxu0 }
  0xca   :  { %v79_v6 = vadd.f32 %v106_v4, %v78_v5 }
  0xcb   :  { %v120_v7 = vpop.f32.mrf.mxu0 }
  0xcc   :  { %v110_v8 = vmul.f32 -1.442695, %v79_v6 }
  0xcd   :  { %v81_v9 = vpop.f32.mrf.mxu0 }
  0xce   :  { %127 = vpow2.f32 %v110_v8 }
  0xcf   :  { %v121_v10 = vpop.f32.mrf.mxu0 }
  0xdb   :  { %v128_v11 = vpop.eup %127 }
  0xdc   :  { %v87_v12 = vadd.f32 1.0, %v128_v11 }
  0xde   :  { %129 = vrcp.f32 %v87_v12 }
  0xeb   :  { %v130_v13 = vpop.eup %129 }
  0xec   :  { %91 = vst.msk [vmem:[#allocation2] sm:$0xff] %vm90_vm2, %v130_v13 }
  0xed   :  { %142 = shalt.err (!%p139_p4)
}
  0xee   :  { %101 = dma.vmem_to_hbm [thread:$0]  %s99_s20, 128, %s194_s3, [#allocation3]  }
  0xef   :  { %151 = dma.done.wait [#allocation3], 128  }
  0xf0   :  { %152 = vsyncadd [#allocation3], 4294967168 }
  0xf1   :  { %105 = vsyncpa [#allocation3], 1 }

</bundles_post_ra>
